<compile_context>
chip_gen: v7x
topology: tpu7x:2x2x1
jax: 0.10.0
libtpu: 0.0.40
codegen_flags: <defaults>
</compile_context>

<pallas_src>
import functools

import jax
import jax.numpy as jnp
from jax.experimental import pallas as pl
from jax.experimental.pallas import tpu as pltpu


def _round_up(x, m):
    return (x + m - 1) // m * m


def _pad_to(a, shape):
    if a.shape == tuple(shape):
        return a
    pads = [(0, t - s) for s, t in zip(a.shape, shape)]
    return jnp.pad(a, pads)


def _tpu_config():
    """Returns (per-core VMEM bytes, multi-TensorCore-per-chip?) with safe fallbacks."""
    vmem_cap = 128 << 20
    multi_core = False
    try:
        info = pltpu.get_tpu_info()
        vmem_cap = int(getattr(info, "vmem_capacity_bytes", vmem_cap))
    except Exception:
        pass
    try:
        kind = jax.devices()[0].device_kind.lower()
        multi_core = "v7" in kind
    except Exception:
        pass
    if vmem_cap <= (64 << 20):     # v7x-class part: 64 MiB per TC, 2 TCs/chip
        multi_core = True
    return vmem_cap, multi_core


def _footprint_bytes(rt, ht, num_h, cin_p, cout_p, itemsize):
    """Approximate VMEM footprint of one grid step (pipeline buffers + scratch)."""
    wbuf = 1 if num_h == 1 else 2                       # resident vs streamed weights
    return (2 * rt * (cin_p + cout_p) * itemsize        # x / out double buffers
            + wbuf * ht * (cin_p + cout_p + 8) * itemsize   # W1, W2, b1 block(s)
            + 8 * cout_p * itemsize                     # b2
            + (rt * cout_p * 4 if num_h > 1 else 0)     # f32 accumulator scratch
            + rt * ht * (4 + itemsize))                 # f32 fc1 tile (+ cast copy)


def _select_tiles(rows, Cin, H, Cout, itemsize, vmem_cap, multi_core,
                  row_tile_req=None, h_tile_req=None):
    sub = max(8, 32 // itemsize)                # sublane pack: 8 (f32) / 16 (bf16)
    cin_p = _round_up(Cin, 128)
    cout_p = _round_up(Cout, 128)
    h_min = _round_up(H, 128)
    rows_r = _round_up(max(rows, 1), sub)
    usable = (vmem_cap * 3) // 4                # ~48 MiB on v7x, ~96 MiB on v5e/v6e

    def cap_rows(rt):
        rt = _round_up(max(sub, min(rt, rows_r)), sub)
        if multi_core and rows_r > sub:
            # >= 2 row tiles so the "parallel" row axis can shard across both TCs.
            rt = min(rt, max(sub, _round_up((rows + 1) // 2, sub)))
        return rt

    # Explicit overrides (testing / tuning).
    if row_tile_req is not None or h_tile_req is not None:
        ht = min(h_min, _round_up(h_tile_req, 128)) if h_tile_req else h_min
        rt = cap_rows(row_tile_req if row_tile_req else 512)
        return rt, ht, cin_p, cout_p, _round_up(H, ht)

    # 1) Resident-weight path: whole padded hidden dim in one block; weights are
    #    DMA'd once per call (constant index map + Buffered(1)).
    rt = cap_rows(512)
    while rt > max(sub, 128) and _footprint_bytes(rt, h_min, 1, cin_p, cout_p, itemsize) > usable:
        rt = _round_up(max(sub, rt // 2), sub)
    if _footprint_bytes(rt, h_min, 1, cin_p, cout_p, itemsize) <= usable:
        return rt, h_min, cin_p, cout_p, h_min

    # 2) Streamed-weight path: large row tile sets arithmetic intensity (weights
    #    are re-read once per row tile); hidden axis tiled in 256-wide chunks
    #    (fills the 256-wide v6e/v7x MXU) sized to the remaining VMEM budget.
    rt = cap_rows(512 if vmem_cap <= (64 << 20) else 1024)
    while True:
        fixed = (2 * rt * (cin_p + cout_p) * itemsize
                 + 8 * cout_p * itemsize
                 + rt * cout_p * 4)
        per_col = 2 * (cin_p + cout_p + 8) * itemsize + rt * (4 + itemsize)
        max_h = (usable - fixed) // per_col if usable > fixed else 0
        if max_h >= 256 or rt <= max(sub, 128):
            break
        rt = _round_up(max(sub, rt // 2), sub)
    if max_h >= 256:
        ht = min(h_min, (max_h // 256) * 256)
    else:
        ht = min(h_min, max(128, (max_h // 128) * 128))
    return rt, ht, cin_p, cout_p, _round_up(H, ht)


def _mlp_kernel_resident(x_ref, w1_ref, b1_ref, w2_ref, b2_ref, o_ref, *, cast_dtype):
    """Whole (padded) hidden dim in one block: no accumulator, direct store."""
    h = jnp.dot(x_ref[...], w1_ref[...], preferred_element_type=jnp.float32)
    h = h + b1_ref[...].astype(jnp.float32)
    h = h * jax.nn.sigmoid(h)                          # SiLU (sigmoid -> EUP), f32
    if cast_dtype is not None:                         # bf16 MXU fast path for fc2
        h = h.astype(cast_dtype)
    y = jnp.dot(h, w2_ref[...], preferred_element_type=jnp.float32)
    o_ref[...] = (y + b2_ref[...].astype(jnp.float32)).astype(o_ref.dtype)


def _mlp_kernel_streamed(x_ref, w1_ref, b1_ref, w2_ref, b2_ref, o_ref, acc_ref, *,
                         cast_dtype):
    """Hidden axis tiled (grid axis 1 = reduction): fc2 partials in f32 scratch."""
    k = pl.program_id(1)

    @pl.when(k == 0)
    def _init():
        acc_ref[...] = jnp.zeros_like(acc_ref)

    h = jnp.dot(x_ref[...], w1_ref[...], preferred_element_type=jnp.float32)
    h = h + b1_ref[...].astype(jnp.float32)
    h = h * jax.nn.sigmoid(h)
    if cast_dtype is not None:
        h = h.astype(cast_dtype)
    acc_ref[...] += jnp.dot(h, w2_ref[...], preferred_element_type=jnp.float32)

    @pl.when(k == pl.num_programs(1) - 1)
    def _finalize():
        o_ref[...] = (acc_ref[...] + b2_ref[...].astype(jnp.float32)).astype(o_ref.dtype)


def mlp_pallas(x, w1, b1, w2, b2, *, compute_dtype=None, row_tile=None, h_tile=None):
    """Fused MLP forward.  x: (B, N, Cin); w1: (Cin, H); w2: (H, Cout).

    compute_dtype: optional MXU dtype (e.g. jnp.bfloat16) for x/W1/W2; the
    accumulators and the SiLU stay in f32 and the output keeps x's dtype.
    """
    B, N, Cin = x.shape
    H = w1.shape[1]
    Cout = w2.shape[1]
    out_dtype = x.dtype

    if compute_dtype is not None:
        compute_dtype = jnp.dtype(compute_dtype)
        if x.dtype != compute_dtype:
            x = x.astype(compute_dtype)
            w1 = w1.astype(compute_dtype)
            w2 = w2.astype(compute_dtype)
    dtype = x.dtype
    itemsize = jnp.dtype(dtype).itemsize
    rows = B * N

    vmem_cap, multi_core = _tpu_config()
    rt, ht, cin_p, cout_p, h_p = _select_tiles(
        rows, Cin, H, Cout, itemsize, vmem_cap, multi_core, row_tile, h_tile)

    rows_p = _round_up(rows, rt)
    num_row = rows_p // rt
    num_h = h_p // ht
    resident = (num_h == 1)

    # Zero padding is exact (SiLU(0)=0; zero weight rows/cols contribute 0) and
    # is skipped entirely when shapes are already aligned.
    # TODO(synk): pre-pad the weights once at init time for repeated forward calls.
    x2d = _pad_to(x.reshape(rows, Cin), (rows_p, cin_p))
    w1_p = _pad_to(w1, (cin_p, h_p))
    w2_p = _pad_to(w2, (h_p, cout_p))
    b1_p = _pad_to(b1.reshape(1, H), (1, h_p))
    b2_p = _pad_to(b2.reshape(1, Cout), (1, cout_p))

    # Resident weights/biases never change block index -> single-buffered and
    # DMA'd once; streamed weights use the default double buffering.
    wmode = pl.Buffered(1) if resident else None
    in_specs = [
        pl.BlockSpec((rt, cin_p), lambda i, k: (i, 0)),
        pl.BlockSpec((cin_p, ht), lambda i, k: (0, k), pipeline_mode=wmode),
        pl.BlockSpec((1, ht), lambda i, k: (0, k), pipeline_mode=wmode),
        pl.BlockSpec((ht, cout_p), lambda i, k: (k, 0), pipeline_mode=wmode),
        pl.BlockSpec((1, cout_p), lambda i, k: (0, 0), pipeline_mode=pl.Buffered(1)),
    ]
    out_specs = pl.BlockSpec((rt, cout_p), lambda i, k: (i, 0))

    cast_dtype = None if dtype == jnp.float32 else dtype
    if resident:
        kernel = functools.partial(_mlp_kernel_resident, cast_dtype=cast_dtype)
        scratch = ()
    else:
        kernel = functools.partial(_mlp_kernel_streamed, cast_dtype=cast_dtype)
        scratch = (pltpu.VMEM((rt, cout_p), jnp.float32),)

    fp = _footprint_bytes(rt, ht, num_h, cin_p, cout_p, itemsize)
    vmem_limit = min(max(32 << 20, int(fp * 1.25) + (4 << 20)), int(vmem_cap * 0.85))

    weight_reads = 1 if resident else num_row
    cost = pl.CostEstimate(
        flops=2 * rows_p * h_p * (cin_p + cout_p),
        transcendentals=rows_p * h_p,
        bytes_accessed=int(
            rows_p * cin_p * itemsize
            + weight_reads * (cin_p * h_p + h_p * cout_p + h_p) * itemsize
            + cout_p * itemsize
            + rows_p * cout_p * jnp.dtype(out_dtype).itemsize),
    )

    out2d = pl.pallas_call(
        kernel,
        out_shape=jax.ShapeDtypeStruct((rows_p, cout_p), out_dtype),
        grid_spec=pltpu.PrefetchScalarGridSpec(
            num_scalar_prefetch=0,
            grid=(num_row, num_h),
            in_specs=in_specs,
            out_specs=out_specs,
            scratch_shapes=scratch,
        ),
        compiler_params=pltpu.CompilerParams(
            dimension_semantics=("parallel", "arbitrary"),
            vmem_limit_bytes=vmem_limit,
        ),
        cost_estimate=cost,
    )(x2d, w1_p, b1_p, w2_p, b2_p)

    return out2d[:rows, :Cout].reshape(B, N, Cout)


def init_mlp_params(key, in_features, hidden_features, out_features, dtype=jnp.float32):
    """PyTorch nn.Linear-style init, weights stored transposed as (in, out)."""
    k1, k2, k3, k4 = jax.random.split(key, 4)
    bound1 = 1.0 / jnp.sqrt(in_features)
    bound2 = 1.0 / jnp.sqrt(hidden_features)
    w1 = jax.random.uniform(k1, (in_features, hidden_features), dtype,
                            minval=-bound1, maxval=bound1)
    b1 = jax.random.uniform(k2, (hidden_features,), dtype,
                            minval=-bound1, maxval=bound1)
    w2 = jax.random.uniform(k3, (hidden_features, out_features), dtype,
                            minval=-bound2, maxval=bound2)
    b2 = jax.random.uniform(k4, (out_features,), dtype,
                            minval=-bound2, maxval=bound2)
    return w1, b1, w2, b2


def mlp_reference(x, w1, b1, w2, b2):
    h = jnp.dot(x, w1) + b1
    h = h * jax.nn.sigmoid(h)
    return jnp.dot(h, w2) + b2


if __name__ == "__main__":
    key = jax.random.PRNGKey(0)
    kx, kp, kx2, kp2, kx3, kp3 = jax.random.split(key, 6)

    # --- test 1: small shapes consistent with the module (resident-weight path) ---
    B, N = 2, 8
    in_f, hid_f, out_f = 32, 64, 32
    x = jax.random.normal(kx, (B, N, in_f), jnp.float32)
    w1, b1, w2, b2 = init_mlp_params(kp, in_f, hid_f, out_f)
    out = jax.block_until_ready(mlp_pallas(x, w1, b1, w2, b2))
    ref = mlp_reference(x, w1, b1, w2, b2)
    assert out.shape == (B, N, out_f)
    assert jnp.allclose(out, ref, atol=1e-5, rtol=1e-5), "mismatch (resident f32)"

    # --- test 2: ragged rows + non-128 features, forced hidden-tiling (streamed) ---
    B2, N2 = 4, 100
    in2, hid2, out2 = 96, 384, 80
    x2 = jax.random.normal(kx2, (B2, N2, in2), jnp.float32)
    p2 = init_mlp_params(kp2, in2, hid2, out2)
    got2 = jax.block_until_ready(mlp_pallas(x2, *p2, h_tile=128))   # num_h = 3
    ref2 = mlp_reference(x2, *p2)
    assert got2.shape == (B2, N2, out2)
    assert jnp.allclose(got2, ref2, atol=1e-4, rtol=1e-4), "mismatch (streamed f32)"

    # --- test 3: bf16 MXU fast path (f32 params, bf16 compute, f32 accumulate) ---
    B3, N3 = 2, 64
    in3, hid3, out3 = 128, 256, 128
    x3 = jax.random.normal(kx3, (B3, N3, in3), jnp.float32)
    p3 = init_mlp_params(kp3, in3, hid3, out3)
    got3 = jax.block_until_ready(mlp_pallas(x3, *p3, compute_dtype=jnp.bfloat16))
    ref3 = mlp_reference(x3, *p3)
    assert got3.shape == (B3, N3, out3)
    assert jnp.allclose(got3, ref3, atol=5e-2, rtol=5e-2), "mismatch (bf16 compute)"

    # TODO(synk): dropout p > 0 not implemented (module default p=0.0 is the identity).
    print("KERNEL_OK")
</pallas_src>

<mosaic_0001>
module attributes {stable_mosaic.version = 11 : i64} {
  func.func @_mlp_kernel_resident(%arg0: i32, %arg1: i32, %arg2: memref<16x128xf32, #tpu.memory_space<vmem>>, %arg3: memref<128x128xf32, #tpu.memory_space<vmem>>, %arg4: memref<1x128xf32, #tpu.memory_space<vmem>>, %arg5: memref<128x128xf32, #tpu.memory_space<vmem>>, %arg6: memref<1x128xf32, #tpu.memory_space<vmem>>, %arg7: memref<16x128xf32, #tpu.memory_space<vmem>>) attributes {dimension_semantics = [#tpu.dimension_semantics<parallel>, #tpu.dimension_semantics<arbitrary>], iteration_bounds = array<i64: 1, 1>, scalar_prefetch = 0 : i64, scratch_operands = 0 : i64, tpu.core_type = #tpu.core_type<tc>, window_params = [{transform_indices = @transform_0, window_bounds = array<i64: 16, 128>}, {pipeline_mode = #tpu.pipeline_mode<synchronous>, transform_indices = @transform_1, window_bounds = array<i64: 128, 128>}, {pipeline_mode = #tpu.pipeline_mode<synchronous>, transform_indices = @transform_2, window_bounds = array<i64: 1, 128>}, {pipeline_mode = #tpu.pipeline_mode<synchronous>, transform_indices = @transform_3, window_bounds = array<i64: 128, 128>}, {pipeline_mode = #tpu.pipeline_mode<synchronous>, transform_indices = @transform_4, window_bounds = array<i64: 1, 128>}, {transform_indices = @transform_5, window_bounds = array<i64: 16, 128>}]} {
    %c0 = arith.constant 0 : index
    %c0_0 = arith.constant 0 : index
    %0 = vector.load %arg2[%c0, %c0_0] : memref<16x128xf32, #tpu.memory_space<vmem>>, vector<16x128xf32>
    %c0_1 = arith.constant 0 : index
    %c0_2 = arith.constant 0 : index
    %1 = vector.load %arg3[%c0_1, %c0_2] : memref<128x128xf32, #tpu.memory_space<vmem>>, vector<128x128xf32>
    %cst = arith.constant dense<0.000000e+00> : vector<16x128xf32>
    %2 = tpu.matmul %0, %1, %cst {dimension_numbers = #tpu.dot_dimension_numbers<[1], [0], [0], [1], [0, 0, 1, 1], [], []>} : vector<16x128xf32>, vector<128x128xf32>, vector<16x128xf32> -> vector<16x128xf32>
    %c0_3 = arith.constant 0 : index
    %c0_4 = arith.constant 0 : index
    %3 = vector.load %arg4[%c0_3, %c0_4] : memref<1x128xf32, #tpu.memory_space<vmem>>, vector<1x128xf32>
    %4 = vector.broadcast %3 : vector<1x128xf32> to vector<16x128xf32>
    %5 = arith.addf %2, %4 : vector<16x128xf32>
    %6 = arith.negf %5 : vector<16x128xf32>
    %7 = math.exp %6 : vector<16x128xf32>
    %cst_5 = arith.constant 1.000000e+00 : f32
    %8 = vector.broadcast %cst_5 : f32 to vector<16x128xf32>
    %9 = arith.addf %8, %7 : vector<16x128xf32>
    %10 = arith.divf %8, %9 : vector<16x128xf32>
    %11 = arith.mulf %5, %10 : vector<16x128xf32>
    %c0_6 = arith.constant 0 : index
    %c0_7 = arith.constant 0 : index
    %12 = vector.load %arg5[%c0_6, %c0_7] : memref<128x128xf32, #tpu.memory_space<vmem>>, vector<128x128xf32>
    %cst_8 = arith.constant dense<0.000000e+00> : vector<16x128xf32>
    %13 = tpu.matmul %11, %12, %cst_8 {dimension_numbers = #tpu.dot_dimension_numbers<[1], [0], [0], [1], [0, 0, 1, 1], [], []>} : vector<16x128xf32>, vector<128x128xf32>, vector<16x128xf32> -> vector<16x128xf32>
    %c0_9 = arith.constant 0 : index
    %c0_10 = arith.constant 0 : index
    %14 = vector.load %arg6[%c0_9, %c0_10] : memref<1x128xf32, #tpu.memory_space<vmem>>, vector<1x128xf32>
    %15 = vector.broadcast %14 : vector<1x128xf32> to vector<16x128xf32>
    %16 = arith.addf %13, %15 : vector<16x128xf32>
    %c0_11 = arith.constant 0 : index
    %c0_12 = arith.constant 0 : index
    %17 = vector.load %arg7[%c0_11, %c0_12] : memref<16x128xf32, #tpu.memory_space<vmem>>, vector<16x128xf32>
    tpu.vector_store %arg7[%c0_11, %c0_12], %16 {strides = array<i32>} : memref<16x128xf32, #tpu.memory_space<vmem>>, vector<16x128xf32>,
    return
  }
  func.func @transform_0(%arg0: i32, %arg1: i32) -> (i32, i32) {
    %c0_i32 = arith.constant 0 : i32
    %c0_i32_0 = arith.constant 0 : i32
    return %arg0, %c0_i32 : i32, i32
  }
  func.func @transform_1(%arg0: i32, %arg1: i32) -> (i32, i32) {
    %c0_i32 = arith.constant 0 : i32
    %c0_i32_0 = arith.constant 0 : i32
    return %c0_i32, %arg1 : i32, i32
  }
  func.func @transform_2(%arg0: i32, %arg1: i32) -> (i32, i32) {
    %c0_i32 = arith.constant 0 : i32
    %c0_i32_0 = arith.constant 0 : i32
    return %c0_i32, %arg1 : i32, i32
  }
  func.func @transform_3(%arg0: i32, %arg1: i32) -> (i32, i32) {
    %c0_i32 = arith.constant 0 : i32
    %c0_i32_0 = arith.constant 0 : i32
    return %arg1, %c0_i32 : i32, i32
  }
  func.func @transform_4(%arg0: i32, %arg1: i32) -> (i32, i32) {
    %c0_i32 = arith.constant 0 : i32
    %c0_i32_0 = arith.constant 0 : i32
    %c0_i32_1 = arith.constant 0 : i32
    return %c0_i32, %c0_i32_0 : i32, i32
  }
  func.func @transform_5(%arg0: i32, %arg1: i32) -> (i32, i32) {
    %c0_i32 = arith.constant 0 : i32
    %c0_i32_0 = arith.constant 0 : i32
    return %arg0, %c0_i32 : i32, i32
  }
}

</mosaic_0001>

<bundles_post_ra>
// kernel: tpu_custom_call.1
= control target key start
LH: loop header
LB: loop body
LE: loop exit
PB: predicated region body
PF: predicated region fallthrough
CT: control target
= control target key end

     0   :  { %10 = vsyncpa [#allocation3], 0  ;;  %s685_s0 = inlined_call_operand.hbm [shape: f32[16,128], index: 0, kind: input, shape index: {}]   ;;  %s686_s1 = inlined_call_operand.hbm [shape: f32[128,128], index: 1, kind: input, shape index: {}]   ;;  %s687_s2 = inlined_call_operand.vmem [shape: f32[1,128], index: 2, kind: input, shape index: {}]   ;;  %s688_s3 = inlined_call_operand.hbm [shape: f32[128,128], index: 3, kind: input, shape index: {}]   ;;  %s689_s4 = inlined_call_operand.vmem [shape: f32[1,128], index: 4, kind: input, shape index: {}]   ;;  %s690_s5 = inlined_call_operand.hbm [shape: f32[16,128], index: 5, kind: output, shape index: {}]  }
   0x1   :  { %11 = vsyncpa [#allocation6], 0 }
   0x2   :  { %12 = vsyncpa [#allocation4], 0  ;;  %s576_s18 = smov [#allocation5]   ;;  %s577_s20 = smov [#allocation2]  }
   0x3   :  { %s30_s19 = sshll.u32 %s576_s18, 4  ;;  %s18_s21 = sshll.u32 %s577_s20, 4  ;;  %s31_s19 = int_to_ptr.vmem [resolvable:$true] %s30_s19  ;;  %s612_s21 = int_to_ptr.vmem [resolvable:$true] %s18_s21 }
   0x4   :  { %s482_s24 = scalar_lea.hbm %s686_s1, 2048 }
   0x5   :  { %p483_p0 = scmp.ne.s32.totalorder %s686_s1, %s482_s24  ;;  %p486_p1 = scmp.lt.u32.totalorder %s482_s24, %s686_s1 }
   0x7   :  { %p488_p2 = pnand %p486_p1, %p483_p0 }
   0x9   :  { %491 = shalt.err (!%p488_p2)
}
   0xa   :  { %s492_s29 = scalar_lea.vmem %s31_s19, 2048  ;;  %p497_p4 = scmp.lt.s32.totalorder %s31_s19, %s31_s19 }
   0xb   :  { %p493_p3 = scmp.ne.s32.totalorder %s31_s19, %s492_s29  ;;  %p498_p5 = scmp.lt.s32.totalorder %s492_s29, %s492_s29 }
   0xd   :  { %p499_p6 = por %p498_p5, %p497_p4 }
   0xf   :  { %p500_p7 = pnand %p499_p6, %p493_p3 }
  0x11   :  { %503 = shalt.err (!%p500_p7)
}
  0x12   :  { %s578_s30 = smov 128   ;;  %s579_s6 = smov 8  }
  0x13   :  { %36 = dma.hbm_to_vmem [thread:$0]  %s686_s1, 2048, %s31_s19, [#allocation6], %s578_s30, %s578_s30, %s579_s6  }
  0x14   :  { %s504_s11 = scalar_lea.hbm %s685_s0, 256 }
  0x15   :  { %p505_p8 = scmp.ne.s32.totalorder %s685_s0, %s504_s11  ;;  %p508_p9 = scmp.lt.u32.totalorder %s504_s11, %s685_s0 }
  0x17   :  { %p510_p10 = pnand %p508_p9, %p505_p8 }
  0x19   :  { %513 = shalt.err (!%p510_p10)
}
  0x1a   :  { %s514_s16 = scalar_lea.vmem %s612_s21, 256  ;;  %p519_p12 = scmp.lt.s32.totalorder %s612_s21, %s612_s21 }
  0x1b   :  { %p515_p11 = scmp.ne.s32.totalorder %s612_s21, %s514_s16  ;;  %p520_p13 = scmp.lt.s32.totalorder %s514_s16, %s514_s16 }
  0x1d   :  { %p521_p0 = por %p520_p13, %p519_p12 }
  0x1f   :  { %p522_p1 = pnand %p521_p0, %p515_p11 }
  0x21   :  { %525 = shalt.err (!%p522_p1)
}
  0x22   :  { %24 = dma.hbm_to_vmem [thread:$0]  %s685_s0, 256, %s612_s21, [#allocation3], %s578_s30, %s578_s30, %s579_s6  }
  0x23   :  { %s580_s18 = smov [#allocation7]   ;;  %s526_s23 = scalar_lea.hbm %s688_s3, 2048 }
  0x24   :  { %s44_s19 = sshll.u32 %s580_s18, 4  ;;  %p527_p2 = scmp.ne.s32.totalorder %s688_s3, %s526_s23  ;;  %s45_s19 = int_to_ptr.vmem [resolvable:$true] %s44_s19 }
  0x25   :  { %p530_p3 = scmp.lt.u32.totalorder %s526_s23, %s688_s3 }
  0x27   :  { %p532_p4 = pnand %p530_p3, %p527_p2 }
  0x29   :  { %535 = shalt.err (!%p532_p4)
}
  0x2a   :  { %s536_s28 = scalar_lea.vmem %s45_s19, 2048  ;;  %p541_p6 = scmp.lt.s32.totalorder %s45_s19, %s45_s19 }
  0x2b   :  { %p537_p5 = scmp.ne.s32.totalorder %s45_s19, %s536_s28  ;;  %p542_p7 = scmp.lt.s32.totalorder %s536_s28, %s536_s28 }
  0x2d   :  { %p543_p8 = por %p542_p7, %p541_p6 }
  0x2f   :  { %p544_p9 = pnand %p543_p8, %p537_p5 }
  0x31   :  { %547 = shalt.err (!%p544_p9)
}
  0x32   :  { %50 = dma.hbm_to_vmem [thread:$0]  %s688_s3, 2048, %s45_s19, [#allocation6], %s578_s30, %s578_s30, %s579_s6  }
  0x33   :  { %570 = dma.done.wait [#allocation3], 256  }
  0x34   :  { %571 = vsyncadd [#allocation3], 4294967040 }
  0x35   :  { %572 = dma.done.wait [#allocation6], 4096  }
  0x36   :  { %573 = vsyncadd [#allocation6], 4294963200  ;;  %v64_v0 = vld [vmem:[#allocation5] sm:$0xff]  ;;  %v65_v1 = vld [vmem:[#allocation5 + $0x8] sm:$0xff]  ;;  %s581_s8 = smov [#allocation8]  }
  0x37   :  { %v66_v2 = vld [vmem:[#allocation5 + $0x10] sm:$0xff]  ;;  %v404_v3 = vpack.c.bf16 %v65_v1, %v64_v0  ;;  %v67_v4 = vld [vmem:[#allocation5 + $0x18] sm:$0xff]  ;;  %v68_v6 = vld [vmem:[#allocation5 + $0x20] sm:$0xff]  ;;  %s281_s9 = sshll.u32 %s581_s8, 4  ;;  %s282_s9 = int_to_ptr.vmem [resolvable:$true] %s281_s9 }
  0x38   :  { %v408_v5 = vpack.c.bf16 %v67_v4, %v66_v2  ;;  %v69_v7 = vld [vmem:[#allocation5 + $0x28] sm:$0xff]  ;;  %v62_v9 = vld [vmem:[#allocation2] sm:$0xff]  ;;  %v71_v11 = vld [vmem:[#allocation5 + $0x38] sm:$0xff]  ;;  %s548_s10 = scalar_lea.vmem %s282_s9, 256  ;;  %p553_p11 = scmp.lt.s32.totalorder %s282_s9, %s282_s9 }
  0x39   :  { %405 = vmatprep.subr.bf16.mxu0 %v404_v3  ;;  %v412_v8 = vpack.c.bf16 %v69_v7, %v68_v6  ;;  %v70_v10 = vld [vmem:[#allocation5 + $0x30] sm:$0xff]  ;;  %366 = vmatprep.mubr.f32.mxu0 %v62_v9  ;;  %v72_v13 = vld [vmem:[#allocation5 + $0x40] sm:$0xff]  ;;  %v73_v14 = vld [vmem:[#allocation5 + $0x48] sm:$0xff]  ;;  %p549_p10 = scmp.ne.s32.totalorder %s282_s9, %s548_s10  ;;  %p554_p12 = scmp.lt.s32.totalorder %s548_s10, %s548_s10 }
  0x3a   :  { %407 = vmatpush3.bf16.msra.mxu0 %v404_v3  ;;  %v416_v12 = vpack.c.bf16 %v71_v11, %v70_v10  ;;  %v420_v15 = vpack.c.bf16 %v73_v14, %v72_v13  ;;  %v74_v16 = vld [vmem:[#allocation5 + $0x50] sm:$0xff]  ;;  %v75_v17 = vld [vmem:[#allocation5 + $0x58] sm:$0xff]  ;;  %v76_v19 = vld [vmem:[#allocation5 + $0x60] sm:$0xff] }
  0x3b   :  { %409 = vmatprep.subr.bf16.mxu0 %v408_v5  ;;  %v424_v18 = vpack.c.bf16 %v75_v17, %v74_v16  ;;  %v77_v20 = vld [vmem:[#allocation5 + $0x68] sm:$0xff]  ;;  %v78_v22 = vld [vmem:[#allocation5 + $0x70] sm:$0xff]  ;;  %v79_v23 = vld [vmem:[#allocation5 + $0x78] sm:$0xff]  ;;  %p555_p13 = por %p554_p12, %p553_p11 }
  0x3c   :  { %v428_v21 = vpack.c.bf16 %v77_v20, %v76_v19  ;;  %v432_v24 = vpack.c.bf16 %v79_v23, %v78_v22  ;;  %v63_v25 = vld [vmem:[#allocation2 + $0x8] sm:$0xff]  ;;  %v176_v26 = vld [vmem:[#allocation7] sm:$0xff]  ;;  %v177_v27 = vld [vmem:[#allocation7 + $0x8] sm:$0xff] }
  0x3d   :  { %v436_v28 = vpack.c.bf16 %v177_v27, %v176_v26  ;;  %v178_v29 = vld [vmem:[#allocation7 + $0x10] sm:$0xff]  ;;  %v179_v30 = vld [vmem:[#allocation7 + $0x18] sm:$0xff]  ;;  %v180_v32 = vld [vmem:[#allocation7 + $0x20] sm:$0xff]  ;;  %p556_p0 = pnand %p555_p13, %p549_p10 }
  0x3e   :  { %411 = vmatpush3.bf16.msra.mxu0 %v408_v5  ;;  %v440_v31 = vpack.c.bf16 %v179_v30, %v178_v29  ;;  %v181_v33 = vld [vmem:[#allocation7 + $0x28] sm:$0xff]  ;;  %v182_v35 = vld [vmem:[#allocation7 + $0x30] sm:$0xff]  ;;  %v183_v36 = vld [vmem:[#allocation7 + $0x38] sm:$0xff] }
  0x3f   :  { %413 = vmatprep.subr.bf16.mxu0 %v412_v8  ;;  %437 = vmatprep.subr.bf16.mxu1 %v436_v28  ;;  %v444_v34 = vpack.c.bf16 %v181_v33, %v180_v32  ;;  %v448_v37 = vpack.c.bf16 %v183_v36, %v182_v35  ;;  %v184_v38 = vld [vmem:[#allocation7 + $0x40] sm:$0xff]  ;;  %v185_v39 = vld [vmem:[#allocation7 + $0x48] sm:$0xff]  ;;  %v186_v41 = vld [vmem:[#allocation7 + $0x50] sm:$0xff] }
  0x40   :  { %439 = vmatpush3.bf16.msra.mxu1 %v436_v28  ;;  %v452_v40 = vpack.c.bf16 %v185_v39, %v184_v38  ;;  %v187_v42 = vld [vmem:[#allocation7 + $0x58] sm:$0xff]  ;;  %v188_v44 = vld [vmem:[#allocation7 + $0x60] sm:$0xff]  ;;  %v189_v45 = vld [vmem:[#allocation7 + $0x68] sm:$0xff] }
  0x41   :  { %441 = vmatprep.subr.bf16.mxu1 %v440_v31  ;;  %v456_v43 = vpack.c.bf16 %v187_v42, %v186_v41  ;;  %v460_v46 = vpack.c.bf16 %v189_v45, %v188_v44  ;;  %v190_v47 = vld [vmem:[#allocation7 + $0x70] sm:$0xff]  ;;  %v191_v48 = vld [vmem:[#allocation7 + $0x78] sm:$0xff] }
  0x42   :  { %415 = vmatpush3.bf16.msra.mxu0 %v412_v8  ;;  %v464_v49 = vpack.c.bf16 %v191_v48, %v190_v47  ;;  %v294_v50 = vld [vmem:[%s687_s2] ss:$0 sm:$0xff] }
  0x43   :  { %417 = vmatprep.subr.bf16.mxu0 %v416_v12  ;;  %v297_v1 = vld [vmem:[%s689_s4] ss:$0 sm:$0xff] }
  0x44   :  { %443 = vmatpush3.bf16.msra.mxu1 %v440_v31 }
  0x45   :  { %445 = vmatprep.subr.bf16.mxu1 %v444_v34 }
  0x46   :  { %419 = vmatpush3.bf16.msra.mxu0 %v416_v12 }
  0x47   :  { %421 = vmatprep.subr.bf16.mxu0 %v420_v15 }
  0x48   :  { %447 = vmatpush3.bf16.msra.mxu1 %v444_v34 }
  0x49   :  { %449 = vmatprep.subr.bf16.mxu1 %v448_v37 }
  0x4a   :  { %423 = vmatpush3.bf16.msra.mxu0 %v420_v15 }
  0x4b   :  { %425 = vmatprep.subr.bf16.mxu0 %v424_v18 }
  0x4c   :  { %451 = vmatpush3.bf16.msra.mxu1 %v448_v37 }
  0x4d   :  { %453 = vmatprep.subr.bf16.mxu1 %v452_v40 }
  0x4e   :  { %427 = vmatpush3.bf16.msra.mxu0 %v424_v18 }
  0x4f   :  { %429 = vmatprep.subr.bf16.mxu0 %v428_v21 }
  0x50   :  { %455 = vmatpush3.bf16.msra.mxu1 %v452_v40 }
  0x51   :  { %457 = vmatprep.subr.bf16.mxu1 %v456_v43 }
  0x52   :  { %431 = vmatpush3.bf16.msra.mxu0 %v428_v21 }
  0x53   :  { %433 = vmatprep.subr.bf16.mxu0 %v432_v24 }
  0x54   :  { %459 = vmatpush3.bf16.msra.mxu1 %v456_v43 }
  0x55   :  { %461 = vmatprep.subr.bf16.mxu1 %v460_v46 }
  0x56   :  { %435 = vmatpush3.bf16.msra.mxu0 %v432_v24 }
  0x58   :  { %463 = vmatpush3.bf16.msra.mxu1 %v460_v46 }
  0x59   :  { %367 = vmatmul.mubr.f32.vlgmr.msra.gmra.mrb[0].mxu0 %v63_v25  ;;  %465 = vmatprep.subr.bf16.mxu1 %v464_v49 }
  0x5c   :  { %467 = vmatpush3.bf16.msra.mxu1 %v464_v49 }
 0x12c   :  { %v368_v51 = vpop.f32.mrb[0].mxu0 }
 0x12d   :  { %v159_v52 = vadd.f32 %v368_v51, %v294_v50  ;;  %v153_v53 = vpop.f32.mrb[1].mxu0 }
 0x12e   :  { %v154_v54 = vadd.f32 %v294_v50, %v153_v53 }
 0x12f   :  { %v296_v55 = vmul.f32 -1.442695, %v159_v52 }
 0x130   :  { %v295_v56 = vmul.f32 -1.442695, %v154_v54 }
 0x131   :  { %474 = vpow2.f32 %v296_v55 }
 0x132   :  { %476 = vpow2.f32 %v295_v56 }
 0x13b   :  { %v475_v57 = vpop.eup %474 }
 0x13c   :  { %v477_v58 = vpop.eup %476  ;;  %v169_v59 = vadd.f32 1.0, %v475_v57 }
 0x13d   :  { %v168_v60 = vadd.f32 1.0, %v477_v58 }
 0x13e   :  { %478 = vrcp.f32 %v169_v59 }
 0x13f   :  { %480 = vrcp.f32 %v168_v60 }
 0x148   :  { %v479_v61 = vpop.eup %478 }
 0x149   :  { %v481_v62 = vpop.eup %480  ;;  %v175_v0 = vmul.f32 %v479_v61, %v159_v52 }
 0x14a   :  { %v174_v63 = vmul.f32 %v481_v62, %v154_v54 }
 0x14c   :  { %401 = vmatprep.mubr.f32.mxu1 %v174_v63 }
 0x14d   :  { %402 = vmatmul.mubr.f32.vlgmr.msra.gmra.mrb[0].mxu1 %v175_v0 }
 0x220   :  { %v403_v2 = vpop.f32.mrb[0].mxu1 }
 0x221   :  { %v271_v3 = vadd.f32 %v403_v2, %v297_v1  ;;  %v265_v4 = vpop.f32.mrb[1].mxu1 }
 0x222   :  { %v266_v5 = vadd.f32 %v297_v1, %v265_v4 }
 0x223   :  { %275 = vst [vmem:[#allocation8 + $0x8] sm:$0xff] %v271_v3 }
 0x224   :  { %274 = vst [vmem:[#allocation8] sm:$0xff] %v266_v5 }
 0x225   :  { %559 = shalt.err (!%p556_p0)
}
 0x226   :  { %s560_s4 = scalar_lea.hbm %s690_s5, 256 }
 0x227   :  { %p561_p1 = scmp.ne.s32.totalorder %s690_s5, %s560_s4  ;;  %p564_p2 = scmp.lt.u32.totalorder %s560_s4, %s690_s5 }
 0x229   :  { %p566_p3 = pnand %p564_p2, %p561_p1 }
 0x22b   :  { %569 = shalt.err (!%p566_p3)
}
 0x22c   :  { %287 = dma.vmem_to_hbm [thread:$0]  %s282_s9, 256, %s690_s5, [#allocation4], %s578_s30, %s578_s30, %s579_s6  }
 0x22d   :  { %574 = dma.done.wait [#allocation4], 256  }
 0x22e   :  { %575 = vsyncadd [#allocation4], 4294967040 }
 0x22f   :  { %291 = vsyncpa [#allocation3], 1 }
 0x230   :  { %292 = vsyncpa [#allocation6], 1 }
 0x231   :  { %293 = vsyncpa [#allocation4], 1 }

</bundles_post_ra>
